<compile_context>
chip_gen: v7x
topology: tpu7x:2x2x1
jax: 0.10.0
libtpu: 0.0.40
codegen_flags: <defaults>
</compile_context>

<pallas_src>
from typing import NamedTuple

import jax
import jax.numpy as jnp
from jax.experimental import pallas as pl
from jax.experimental.pallas import tpu as pltpu

_LANE = 128
_MAX_BLOCK_K = 2048      # K-tile ceiling (only used when full-K residency can't fit)
_MAX_BLOCK_B = 512       # diminishing returns past ~512 batch rows
_BUDGET_FRACTION = 0.85  # headroom inside the budget for Mosaic internal scratch


def _round_up(x, m):
    return ((x + m - 1) // m) * m


def _vmem_budget_bytes():
    # ~3/4 of reported VMEM: ~96 MiB on v5e/v6e (128 MiB parts), ~48 MiB on v7x.
    cap = 128 * 1024 * 1024
    try:
        cap = int(pltpu.get_tpu_info().vmem_capacity_bytes)
    except Exception:
        pass
    return int(cap * 3 // 4)


def _num_tensorcores():
    # Only used to decide whether force-splitting the batch axis pays off
    # (it only does on chips with >1 TensorCore, e.g. v7x / v4 / v5p megacore).
    try:
        info = pltpu.get_tpu_info()
        for attr in ("num_cores", "core_count", "num_tensorcores"):
            v = getattr(info, attr, None)
            if isinstance(v, int) and v > 0:
                return v
    except Exception:
        pass
    try:
        kind = jax.devices()[0].device_kind.lower()
        if any(t in kind for t in ("v4", "v5p", "v7")):
            return 2
    except Exception:
        pass
    return 1


class LowRankPlan(NamedTuple):
    in_size: int
    out_size: int
    rank: int
    in_p: int      # K dim of ut (== in_size in the common full-K case: no x padding)
    rank_p: int
    out_p: int
    block_k: int
    n_kb: int


def _plan_k(in_size, rank_p, out_p, x_itemsize, w_itemsize, budget, force_block_k=None):
    """Budget-driven choice: full-K residency (preferred) vs. K tiling.

    We shrink block_b down to the sublane minimum before ever resorting to
    K tiling, because K tiling forces Ut to be re-streamed from HBM once per
    batch block -- pure extra bytes on a bandwidth-bound kernel.
    """
    if force_block_k is not None and force_block_k < in_size:
        assert force_block_k % _LANE == 0
        return int(force_block_k), False
    usable = int(budget * _BUDGET_FRACTION)
    row_align = max(8, 32 // x_itemsize)
    # Pallas double-buffers every BlockSpec operand by default -> count 2x.
    w_full = 2 * (in_size * rank_p + rank_p * out_p) * w_itemsize
    per_row_full = 2 * (in_size + out_p) * x_itemsize
    if w_full + row_align * per_row_full <= usable:
        return in_size, True
    block_k = _MAX_BLOCK_K
    while block_k > _LANE:
        w_tiled = 2 * (block_k * rank_p + rank_p * out_p) * w_itemsize
        per_row = 2 * (block_k + out_p) * x_itemsize + rank_p * 4  # + f32 h accumulator
        if w_tiled + row_align * per_row <= usable:
            break
        block_k //= 2
    return block_k, False


def prepare_low_rank_weights(u_weight, v_weight, *, x_dtype=None, weight_dtype=None,
                             force_block_k=None):
    """One-time weight prep: transpose + zero-pad to lane/MXU-friendly shapes.

    u_weight: (rank, input_size)  -> ut: (in_p, rank_p)
    v_weight: (output_size, rank) -> vt: (rank_p, out_p)
    Padded rows/cols are zero, so the math is unchanged.  Pass
    weight_dtype=jnp.bfloat16 for the halved-HBM-traffic path (f32 accumulation
    is kept inside the kernel).  Returns (ut, vt, plan); pass all three to
    low_rank_linear so the tiling chosen here and in the wrapper never disagree.
    In the common full-K case the K dim of ut equals input_size exactly, so x
    never needs a wrapper-side padding copy (full-dim blocks are always legal).
    """
    rank, in_size = u_weight.shape
    out_size, rank_v = v_weight.shape
    assert rank == rank_v, "u/v rank mismatch"
    if weight_dtype is not None:
        u_weight = u_weight.astype(weight_dtype)
        v_weight = v_weight.astype(weight_dtype)
    w_dtype = u_weight.dtype
    x_itemsize = (jnp.dtype(x_dtype).itemsize if x_dtype is not None
                  else jnp.dtype(w_dtype).itemsize)
    rank_p = _round_up(rank, _LANE)
    out_p = _round_up(out_size, _LANE)
    block_k, full_k = _plan_k(in_size, rank_p, out_p, x_itemsize,
                              jnp.dtype(w_dtype).itemsize, _vmem_budget_bytes(),
                              force_block_k=force_block_k)
    if full_k:
        in_p, n_kb = in_size, 1
    else:
        in_p = _round_up(in_size, block_k)
        n_kb = in_p // block_k
    ut = jnp.zeros((in_p, rank_p), w_dtype).at[:in_size, :rank].set(u_weight.T)
    vt = jnp.zeros((rank_p, out_p), w_dtype).at[:rank, :out_size].set(v_weight.T)
    plan = LowRankPlan(in_size, out_size, rank, in_p, rank_p, out_p, block_k, n_kb)
    return ut, vt, plan


def _pick_block_b(B, block_k, rank_p, out_p, x_itemsize, w_itemsize, n_kb, budget,
                  num_tc):
    row_align = max(8, 32 // x_itemsize)   # sublane packing: 8 rows f32 / 16 rows bf16
    if B <= row_align:
        return B                            # tiny batch: one full-dim (always legal) block
    usable = int(budget * _BUDGET_FRACTION)
    w_bytes = 2 * (block_k * rank_p + rank_p * out_p) * w_itemsize
    acc_per_row = rank_p * 4 if n_kb > 1 else 0
    per_row = 2 * (block_k + out_p) * x_itemsize + acc_per_row
    bb = max(0, usable - w_bytes) // per_row
    bb = min(bb, _MAX_BLOCK_B)
    if num_tc >= 2:
        # Split the "parallel" batch axis across TensorCores (v7x megacore).
        bb = min(bb, _round_up(pl.cdiv(B, num_tc), row_align))
    bb = max(row_align, (bb // row_align) * row_align)
    return B if bb >= B else bb


def _low_rank_kernel_full_k(x_ref, ut_ref, vt_ref, o_ref):
    # Common case (n_kb == 1): no VMEM accumulator round trip.
    h = jnp.dot(x_ref[...], ut_ref[...], preferred_element_type=jnp.float32)
    h = h.astype(vt_ref.dtype)   # bf16-native MXU path when weights are bf16
    o_ref[...] = jnp.dot(h, vt_ref[...],
                         preferred_element_type=jnp.float32).astype(o_ref.dtype)


def _low_rank_kernel_k_tiled(x_ref, ut_ref, vt_ref, o_ref, h_acc):
    k = pl.program_id(1)
    partial = jnp.dot(x_ref[...], ut_ref[...], preferred_element_type=jnp.float32)

    @pl.when(k == 0)
    def _():
        h_acc[...] = partial            # direct write: no zero-init pass

    @pl.when(k > 0)
    def _():
        h_acc[...] += partial

    @pl.when(k == pl.num_programs(1) - 1)
    def _():
        h = h_acc[...].astype(vt_ref.dtype)
        o_ref[...] = jnp.dot(h, vt_ref[...],
                             preferred_element_type=jnp.float32).astype(o_ref.dtype)


def low_rank_linear(x, ut, vt, plan, *, block_b=None, pad_output=False):
    """x: (B, input_size).  ut/vt/plan from prepare_low_rank_weights.

    pad_output=True returns the (B, out_p) padded result and skips the final
    slice (a full extra HBM pass) when the consumer tolerates padded width.
    """
    B, K = x.shape
    assert K == plan.in_size, f"x feature dim {K} != input_size {plan.in_size}"
    assert ut.shape == (plan.in_p, plan.rank_p)
    assert vt.shape == (plan.rank_p, plan.out_p)

    full_k = plan.n_kb == 1
    block_k, n_kb = plan.block_k, plan.n_kb
    rank_p, out_p = plan.rank_p, plan.out_p

    if not full_k and plan.in_p != K:
        # Rare case (huge AND ragged input_size with K tiling): one extra HBM pass.
        x = jnp.zeros((B, plan.in_p), x.dtype).at[:, :K].set(x)

    budget = _vmem_budget_bytes()
    num_tc = _num_tensorcores()
    if block_b is None:
        block_b = _pick_block_b(B, block_k, rank_p, out_p, x.dtype.itemsize,
                                ut.dtype.itemsize, n_kb, budget, num_tc)
    n_bb = pl.cdiv(B, block_b)

    cost = pl.CostEstimate(
        flops=2 * B * plan.in_p * rank_p + 2 * B * rank_p * out_p,
        transcendentals=0,
        bytes_accessed=(x.size * x.dtype.itemsize
                        + ut.size * ut.dtype.itemsize * (n_bb if n_kb > 1 else 1)
                        + vt.size * vt.dtype.itemsize
                        + B * out_p * x.dtype.itemsize),
    )

    if full_k:
        grid = (n_bb,)
        in_specs = [
            pl.BlockSpec((block_b, plan.in_p), lambda i: (i, 0)),
            pl.BlockSpec((plan.in_p, rank_p), lambda i: (0, 0)),
            pl.BlockSpec((rank_p, out_p), lambda i: (0, 0)),
        ]
        out_specs = pl.BlockSpec((block_b, out_p), lambda i: (i, 0))
        scratch_shapes = []
        kernel = _low_rank_kernel_full_k
        dim_sem = ("parallel",)
    else:
        grid = (n_bb, n_kb)
        in_specs = [
            pl.BlockSpec((block_b, block_k), lambda i, k: (i, k)),
            pl.BlockSpec((block_k, rank_p), lambda i, k: (k, 0)),
            pl.BlockSpec((rank_p, out_p), lambda i, k: (0, 0)),
        ]
        out_specs = pl.BlockSpec((block_b, out_p), lambda i, k: (i, 0))
        scratch_shapes = [pltpu.VMEM((block_b, rank_p), jnp.float32)]
        kernel = _low_rank_kernel_k_tiled
        dim_sem = ("parallel", "arbitrary")

    y = pl.pallas_call(
        kernel,
        out_shape=jax.ShapeDtypeStruct((B, out_p), x.dtype),
        grid_spec=pltpu.PrefetchScalarGridSpec(
            num_scalar_prefetch=0,
            grid=grid,
            in_specs=in_specs,
            out_specs=out_specs,
            scratch_shapes=scratch_shapes,
        ),
        compiler_params=pltpu.CompilerParams(
            dimension_semantics=dim_sem,
            vmem_limit_bytes=budget,
        ),
        cost_estimate=cost,
    )(x, ut, vt)

    if pad_output or out_p == plan.out_size:
        return y
    return y[:, :plan.out_size]


def make_params(key, input_size, output_size, rank, dtype=jnp.float32):
    """Deterministic orthogonal init, mirroring nn.init.orthogonal_ on Linear weights."""
    ku, kv = jax.random.split(key)
    ortho = jax.nn.initializers.orthogonal()
    u_weight = ortho(ku, (rank, input_size), dtype)    # u.weight shape (rank, in)
    v_weight = ortho(kv, (output_size, rank), dtype)   # v.weight shape (out, rank)
    return u_weight, v_weight


if __name__ == "__main__":
    keys = jax.random.split(jax.random.PRNGKey(0), 8)

    # Case 1: small shapes matching the module (batch=8, in=32, out=32, rank=8).
    x = jax.random.normal(keys[0], (8, 32), jnp.float32)
    u_w, v_w = make_params(keys[1], 32, 32, 8)
    ut, vt, plan = prepare_low_rank_weights(u_w, v_w, x_dtype=x.dtype)
    y = jax.block_until_ready(low_rank_linear(x, ut, vt, plan))
    y_ref = (x @ u_w.T) @ v_w.T
    assert y.shape == (8, 32)
    assert jnp.allclose(y, y_ref, atol=1e-4, rtol=1e-4)

    # Case 2: ragged batch + non-128 in/out sizes; common full-K residency path.
    x2 = jax.random.normal(keys[2], (20, 160), jnp.float32)
    u_w2, v_w2 = make_params(keys[3], 160, 48, 8)
    ut2, vt2, plan2 = prepare_low_rank_weights(u_w2, v_w2, x_dtype=x2.dtype)
    assert plan2.n_kb == 1
    y2 = jax.block_until_ready(low_rank_linear(x2, ut2, vt2, plan2))
    y2_ref = (x2 @ u_w2.T) @ v_w2.T
    assert y2.shape == (20, 48)
    assert jnp.allclose(y2, y2_ref, atol=1e-4, rtol=1e-4)

    # Case 3: forced K tiling (exercises the accumulator kernel + ragged K pad).
    x3 = jax.random.normal(keys[4], (20, 200), jnp.float32)
    u_w3, v_w3 = make_params(keys[5], 200, 48, 8)
    ut3, vt3, plan3 = prepare_low_rank_weights(u_w3, v_w3, x_dtype=x3.dtype,
                                               force_block_k=128)
    assert plan3.n_kb == 2
    y3 = jax.block_until_ready(low_rank_linear(x3, ut3, vt3, plan3))
    y3_ref = (x3 @ u_w3.T) @ v_w3.T
    assert y3.shape == (20, 48)
    assert jnp.allclose(y3, y3_ref, atol=1e-4, rtol=1e-4)

    # Case 4: bf16 weights + activations (halved HBM traffic; f32 accumulation).
    u_w4, v_w4 = make_params(keys[6], 64, 96, 16)
    x4 = jax.random.normal(keys[7], (16, 64), jnp.float32).astype(jnp.bfloat16)
    ut4, vt4, plan4 = prepare_low_rank_weights(u_w4, v_w4, x_dtype=jnp.bfloat16,
                                               weight_dtype=jnp.bfloat16)
    y4 = jax.block_until_ready(low_rank_linear(x4, ut4, vt4, plan4))
    y4_ref = (x4.astype(jnp.float32)
              @ u_w4.astype(jnp.bfloat16).astype(jnp.float32).T
              ) @ v_w4.astype(jnp.bfloat16).astype(jnp.float32).T
    assert y4.shape == (16, 96)
    assert jnp.allclose(y4.astype(jnp.float32), y4_ref, atol=5e-2, rtol=5e-2)

    print("KERNEL_OK")
</pallas_src>

<mosaic_0001>
module attributes {stable_mosaic.version = 11 : i64} {
  func.func @_low_rank_kernel_full_k(%arg0: i32, %arg1: memref<8x32xf32, #tpu.memory_space<vmem>>, %arg2: memref<32x128xf32, #tpu.memory_space<vmem>>, %arg3: memref<128x128xf32, #tpu.memory_space<vmem>>, %arg4: memref<8x128xf32, #tpu.memory_space<vmem>>) attributes {dimension_semantics = [#tpu.dimension_semantics<parallel>], iteration_bounds = array<i64: 1>, scalar_prefetch = 0 : i64, scratch_operands = 0 : i64, tpu.core_type = #tpu.core_type<tc>, window_params = [{transform_indices = @transform_0, window_bounds = array<i64: 8, 32>}, {pipeline_mode = #tpu.pipeline_mode<synchronous>, transform_indices = @transform_1, window_bounds = array<i64: 32, 128>}, {pipeline_mode = #tpu.pipeline_mode<synchronous>, transform_indices = @transform_2, window_bounds = array<i64: 128, 128>}, {transform_indices = @transform_3, window_bounds = array<i64: 8, 128>}]} {
    %c0 = arith.constant 0 : index
    %c0_0 = arith.constant 0 : index
    %0 = vector.load %arg1[%c0, %c0_0] : memref<8x32xf32, #tpu.memory_space<vmem>>, vector<8x32xf32>
    %c0_1 = arith.constant 0 : index
    %c0_2 = arith.constant 0 : index
    %1 = vector.load %arg2[%c0_1, %c0_2] : memref<32x128xf32, #tpu.memory_space<vmem>>, vector<32x128xf32>
    %cst = arith.constant dense<0.000000e+00> : vector<8x128xf32>
    %2 = tpu.matmul %0, %1, %cst {dimension_numbers = #tpu.dot_dimension_numbers<[1], [0], [0], [1], [0, 0, 1, 1], [], []>} : vector<8x32xf32>, vector<32x128xf32>, vector<8x128xf32> -> vector<8x128xf32>
    %c0_3 = arith.constant 0 : index
    %c0_4 = arith.constant 0 : index
    %3 = vector.load %arg3[%c0_3, %c0_4] : memref<128x128xf32, #tpu.memory_space<vmem>>, vector<128x128xf32>
    %cst_5 = arith.constant dense<0.000000e+00> : vector<8x128xf32>
    %4 = tpu.matmul %2, %3, %cst_5 {dimension_numbers = #tpu.dot_dimension_numbers<[1], [0], [0], [1], [0, 0, 1, 1], [], []>} : vector<8x128xf32>, vector<128x128xf32>, vector<8x128xf32> -> vector<8x128xf32>
    %c0_6 = arith.constant 0 : index
    %c0_7 = arith.constant 0 : index
    %5 = vector.load %arg4[%c0_6, %c0_7] : memref<8x128xf32, #tpu.memory_space<vmem>>, vector<8x128xf32>
    tpu.vector_store %arg4[%c0_6, %c0_7], %4 {strides = array<i32>} : memref<8x128xf32, #tpu.memory_space<vmem>>, vector<8x128xf32>,
    return
  }
  func.func @transform_0(%arg0: i32) -> (i32, i32) {
    %c0_i32 = arith.constant 0 : i32
    %c0_i32_0 = arith.constant 0 : i32
    return %arg0, %c0_i32 : i32, i32
  }
  func.func @transform_1(%arg0: i32) -> (i32, i32) {
    %c0_i32 = arith.constant 0 : i32
    %c0_i32_0 = arith.constant 0 : i32
    %c0_i32_1 = arith.constant 0 : i32
    return %c0_i32, %c0_i32_0 : i32, i32
  }
  func.func @transform_2(%arg0: i32) -> (i32, i32) {
    %c0_i32 = arith.constant 0 : i32
    %c0_i32_0 = arith.constant 0 : i32
    %c0_i32_1 = arith.constant 0 : i32
    return %c0_i32, %c0_i32_0 : i32, i32
  }
  func.func @transform_3(%arg0: i32) -> (i32, i32) {
    %c0_i32 = arith.constant 0 : i32
    %c0_i32_0 = arith.constant 0 : i32
    return %arg0, %c0_i32 : i32, i32
  }
}

</mosaic_0001>

<bundles_post_ra>
// kernel: tpu_custom_call.1
= control target key start
LH: loop header
LB: loop body
LE: loop exit
PB: predicated region body
PF: predicated region fallthrough
CT: control target
= control target key end

     0   :  { %8 = vsyncpa [#allocation3], 0  ;;  %s521_s0 = inlined_call_operand.hbm [shape: f32[8,32], index: 0, kind: input, shape index: {}]   ;;  %s522_s1 = inlined_call_operand.hbm [shape: f32[32,128], index: 1, kind: input, shape index: {}]   ;;  %s523_s2 = inlined_call_operand.hbm [shape: f32[128,128], index: 2, kind: input, shape index: {}]   ;;  %s524_s3 = inlined_call_operand.hbm [shape: f32[8,128], index: 3, kind: output, shape index: {}]  }
   0x1   :  { %9 = vsyncpa [#allocation6], 0 }
   0x2   :  { %10 = vsyncpa [#allocation4], 0  ;;  %s438_s12 = smov [#allocation5]   ;;  %s344_s16 = scalar_lea.hbm %s522_s1, 512 }
   0x3   :  { %s26_s13 = sshll.u32 %s438_s12, 4  ;;  %p345_p0 = scmp.ne.s32.totalorder %s522_s1, %s344_s16  ;;  %s27_s13 = int_to_ptr.vmem [resolvable:$true] %s26_s13 }
   0x4   :  { %p348_p1 = scmp.lt.u32.totalorder %s344_s16, %s522_s1 }
   0x6   :  { %p350_p2 = pnand %p348_p1, %p345_p0 }
   0x8   :  { %353 = shalt.err (!%p350_p2)
}
   0x9   :  { %s354_s21 = scalar_lea.vmem %s27_s13, 512  ;;  %p359_p4 = scmp.lt.s32.totalorder %s27_s13, %s27_s13 }
   0xa   :  { %p355_p3 = scmp.ne.s32.totalorder %s27_s13, %s354_s21  ;;  %p360_p5 = scmp.lt.s32.totalorder %s354_s21, %s354_s21 }
   0xc   :  { %p361_p6 = por %p360_p5, %p359_p4 }
   0xe   :  { %p362_p7 = pnand %p361_p6, %p355_p3 }
  0x10   :  { %365 = shalt.err (!%p362_p7)
}
  0x11   :  { %s439_s22 = smov 128   ;;  %s440_s23 = smov 8  }
  0x12   :  { %32 = dma.hbm_to_vmem [thread:$0]  %s522_s1, 512, %s27_s13, [#allocation6], %s439_s22, %s439_s22, %s440_s23  }
  0x13   :  { %s441_s26 = smov [#allocation2]   ;;  %s442_s28 = smov [#allocation7]  }
  0x14   :  { %s17_s27 = sshll.u32 %s441_s26, 4  ;;  %s38_s29 = sshll.u32 %s442_s28, 4  ;;  %s18_s27 = int_to_ptr.vmem [resolvable:$true] %s17_s27  ;;  %s39_s29 = int_to_ptr.vmem [resolvable:$true] %s38_s29 }
  0x15   :  { %s366_s5 = scalar_lea.hbm %s521_s0, 128 }
  0x16   :  { %p367_p8 = scmp.ne.s32.totalorder %s521_s0, %s366_s5  ;;  %p370_p9 = scmp.lt.u32.totalorder %s366_s5, %s521_s0 }
  0x18   :  { %p372_p10 = pnand %p370_p9, %p367_p8 }
  0x1a   :  { %375 = shalt.err (!%p372_p10)
}
  0x1b   :  { %s376_s1 = scalar_lea.vmem %s18_s27, 128  ;;  %p381_p12 = scmp.lt.s32.totalorder %s18_s27, %s18_s27 }
  0x1c   :  { %p377_p11 = scmp.ne.s32.totalorder %s18_s27, %s376_s1  ;;  %p382_p13 = scmp.lt.s32.totalorder %s376_s1, %s376_s1 }
  0x1e   :  { %p383_p0 = por %p382_p13, %p381_p12 }
  0x20   :  { %p384_p1 = pnand %p383_p0, %p377_p11 }
  0x22   :  { %387 = shalt.err (!%p384_p1)
}
  0x23   :  { %20 = dma.hbm_to_vmem [thread:$0]  %s521_s0, 128, %s18_s27, [#allocation3]  }
  0x24   :  { %s388_s14 = scalar_lea.hbm %s523_s2, 2048 }
  0x25   :  { %p389_p2 = scmp.ne.s32.totalorder %s523_s2, %s388_s14  ;;  %p392_p3 = scmp.lt.u32.totalorder %s388_s14, %s523_s2 }
  0x27   :  { %p394_p4 = pnand %p392_p3, %p389_p2 }
  0x29   :  { %397 = shalt.err (!%p394_p4)
}
  0x2a   :  { %s398_s19 = scalar_lea.vmem %s39_s29, 2048  ;;  %p403_p6 = scmp.lt.s32.totalorder %s39_s29, %s39_s29 }
  0x2b   :  { %p399_p5 = scmp.ne.s32.totalorder %s39_s29, %s398_s19  ;;  %p404_p7 = scmp.lt.s32.totalorder %s398_s19, %s398_s19 }
  0x2d   :  { %p405_p8 = por %p404_p7, %p403_p6 }
  0x2f   :  { %p406_p9 = pnand %p405_p8, %p399_p5 }
  0x31   :  { %409 = shalt.err (!%p406_p9)
}
  0x32   :  { %44 = dma.hbm_to_vmem [thread:$0]  %s523_s2, 2048, %s39_s29, [#allocation6], %s439_s22, %s439_s22, %s440_s23  }
  0x33   :  { %432 = dma.done.wait [#allocation3], 128  }
  0x34   :  { %433 = vsyncadd [#allocation3], 4294967168 }
  0x35   :  { %434 = dma.done.wait [#allocation6], 2560  }
  0x36   :  { %435 = vsyncadd [#allocation6], 4294964736  ;;  %v443_v0 = vmov 0.0|0.0   ;;  %vm444_vm0 = vmmov 0   ;;  %v445_v1 = vmov 0.0   ;;  %v55_v2 = vld [vmem:[#allocation5] sm:$0xff] }
  0x37   :  { %305 = vmatprep.subr.bf16.mxu0 %v443_v0  ;;  %267 = vmatprep.mubr.msk.f32.mxu0 %vm444_vm0, %v445_v1  ;;  %v56_v3 = vld [vmem:[#allocation5 + $0x8] sm:$0xff]  ;;  %v57_v4 = vld [vmem:[#allocation5 + $0x10] sm:$0xff]  ;;  %v58_v6 = vld [vmem:[#allocation5 + $0x18] sm:$0xff]  ;;  %vm59_vm1 = vcmask 261120   ;;  %s446_s2 = smov [#allocation8]  }
  0x38   :  { %311 = vmatprep.subr.bf16.mxu1 %v443_v0  ;;  %302 = vmatprep.mubr.msk.f32.mxu1 %vm444_vm0, %v445_v1  ;;  %v306_v5 = vpack.c.bf16 %v56_v3, %v55_v2  ;;  %v133_v7 = vld [vmem:[#allocation7] sm:$0xff]  ;;  %v134_v8 = vld [vmem:[#allocation7 + $0x8] sm:$0xff]  ;;  %v135_v9 = vld [vmem:[#allocation7 + $0x10] sm:$0xff]  ;;  %v309_v11 = vpack.c.bf16 %v58_v6, %v57_v4  ;;  %s226_s21 = sshll.u32 %s446_s2, 4  ;;  %s227_s21 = int_to_ptr.vmem [resolvable:$true] %s226_s21 }
  0x39   :  { %v136_v10 = vld [vmem:[#allocation7 + $0x18] sm:$0xff]  ;;  %v312_v12 = vpack.c.bf16 %v134_v8, %v133_v7  ;;  %v137_v14 = vld [vmem:[#allocation7 + $0x20] sm:$0xff]  ;;  %v138_v15 = vld [vmem:[#allocation7 + $0x28] sm:$0xff]  ;;  %s410_s22 = scalar_lea.vmem %s227_s21, 128  ;;  %p415_p11 = scmp.lt.s32.totalorder %s227_s21, %s227_s21 }
  0x3a   :  { %307 = vmatpush3.bf16.msra.mxu0 %v306_v5  ;;  %v315_v13 = vpack.c.bf16 %v136_v10, %v135_v9  ;;  %v54_v16 = vld [vmem:[#allocation2] sm:$0xff]  ;;  %v318_v17 = vpack.c.bf16 %v138_v15, %v137_v14  ;;  %v139_v18 = vld [vmem:[#allocation7 + $0x30] sm:$0xff]  ;;  %v141_v21 = vld [vmem:[#allocation7 + $0x40] sm:$0xff]  ;;  %p411_p10 = scmp.ne.s32.totalorder %s227_s21, %s410_s22  ;;  %p416_p12 = scmp.lt.s32.totalorder %s410_s22, %s410_s22 }
  0x3b   :  { %308 = vmatprep.subr.bf16.mxu0 %v443_v0  ;;  %313 = vmatpush3.bf16.msra.mxu1 %v312_v12  ;;  %v140_v19 = vld [vmem:[#allocation7 + $0x38] sm:$0xff]  ;;  %v142_v22 = vld [vmem:[#allocation7 + $0x48] sm:$0xff]  ;;  %v143_v24 = vld [vmem:[#allocation7 + $0x50] sm:$0xff] }
  0x3c   :  { %314 = vmatprep.subr.bf16.mxu1 %v443_v0  ;;  %v321_v20 = vpack.c.bf16 %v140_v19, %v139_v18  ;;  %v324_v23 = vpack.c.bf16 %v142_v22, %v141_v21  ;;  %v144_v25 = vld [vmem:[#allocation7 + $0x58] sm:$0xff]  ;;  %v145_v27 = vld [vmem:[#allocation7 + $0x60] sm:$0xff]  ;;  %v146_v28 = vld [vmem:[#allocation7 + $0x68] sm:$0xff]  ;;  %p417_p13 = por %p416_p12, %p415_p11 }
  0x3d   :  { %v327_v26 = vpack.c.bf16 %v144_v25, %v143_v24  ;;  %v330_v29 = vpack.c.bf16 %v146_v28, %v145_v27  ;;  %v147_v30 = vld [vmem:[#allocation7 + $0x70] sm:$0xff]  ;;  %v148_v31 = vld [vmem:[#allocation7 + $0x78] sm:$0xff] }
  0x3e   :  { %310 = vmatpush3.bf16.msra.mxu0 %v309_v11  ;;  %v333_v32 = vpack.c.bf16 %v148_v31, %v147_v30  ;;  %p418_p0 = pnand %p417_p13, %p411_p10 }
  0x3f   :  { %316 = vmatpush3.bf16.msra.mxu1 %v315_v13 }
  0x40   :  { %317 = vmatprep.subr.bf16.mxu1 %v443_v0 }
  0x41   :  { %268 = vmatmul.mubr.msk.f32.vlgmr.msra.gmra.mrb[0].mxu0 %vm59_vm1, %v54_v16 }
  0x43   :  { %319 = vmatpush3.bf16.msra.mxu1 %v318_v17 }
  0x44   :  { %320 = vmatprep.subr.bf16.mxu1 %v443_v0 }
  0x47   :  { %322 = vmatpush3.bf16.msra.mxu1 %v321_v20 }
  0x48   :  { %323 = vmatprep.subr.bf16.mxu1 %v443_v0 }
  0x4b   :  { %325 = vmatpush3.bf16.msra.mxu1 %v324_v23 }
  0x4c   :  { %326 = vmatprep.subr.bf16.mxu1 %v443_v0 }
  0x4f   :  { %328 = vmatpush3.bf16.msra.mxu1 %v327_v26 }
  0x50   :  { %329 = vmatprep.subr.bf16.mxu1 %v443_v0 }
  0x53   :  { %331 = vmatpush3.bf16.msra.mxu1 %v330_v29 }
  0x54   :  { %332 = vmatprep.subr.bf16.mxu1 %v443_v0 }
  0x57   :  { %334 = vmatpush3.bf16.msra.mxu1 %v333_v32 }
 0x114   :  { %v129_v33 = vpop.f32.mrb[0].mxu0 }
 0x115   :  { %v269_v34 = vpop.f32.mrb[1].mxu0  ;;  %303 = vmatmul.mubr.f32.vlgmr.msra.gmra.mrb[0].mxu1 %v129_v33 }
 0x1e8   :  { %v215_v35 = vpop.f32.mrb[0].mxu1 }
 0x1e9   :  { %219 = vst [vmem:[#allocation8] sm:$0xff] %v215_v35  ;;  %v304_v36 = vpop.f32.mrb[1].mxu1 }
 0x1ea   :  { %421 = shalt.err (!%p418_p0)
}
 0x1eb   :  { %s422_s25 = scalar_lea.hbm %s524_s3, 128 }
 0x1ec   :  { %p423_p1 = scmp.ne.s32.totalorder %s524_s3, %s422_s25  ;;  %p426_p2 = scmp.lt.u32.totalorder %s422_s25, %s524_s3 }
 0x1ee   :  { %p428_p3 = pnand %p426_p2, %p423_p1 }
 0x1f0   :  { %431 = shalt.err (!%p428_p3)
}
 0x1f1   :  { %229 = dma.vmem_to_hbm [thread:$0]  %s227_s21, 128, %s524_s3, [#allocation4]  }
 0x1f2   :  { %436 = dma.done.wait [#allocation4], 128  }
 0x1f3   :  { %437 = vsyncadd [#allocation4], 4294967168 }
 0x1f4   :  { %233 = vsyncpa [#allocation3], 1 }
 0x1f5   :  { %234 = vsyncpa [#allocation6], 1 }
 0x1f6   :  { %235 = vsyncpa [#allocation4], 1 }

</bundles_post_ra>
